<compile_context>
chip_gen: v6e
topology: v6e:2x2x1
jax: 0.10.0
libtpu: 0.0.40
codegen_flags: <defaults>
</compile_context>

<pallas_src>
import functools
import math

import jax
import jax.numpy as jnp
from jax.experimental import pallas as pl
from jax.experimental.pallas import tpu as pltpu


_LANE_W = 512                      # lane-dense last dim (multiple of 128 -> unmasked stores)
_MAX_BLOCK_ROWS = 2048             # (2048, 512) f32 block = 4 MiB
_SUBLANE_QUANT = 16                # multiple of both f32 (8) and bf16 (16) sublane tiles
_PAD_LOGIT = -100.0                # exp(-100) == 0 in f32 -> padded elements give exactly 0 loss
_VMEM_LIMIT_BYTES = 48 * 1024 * 1024


def _round_up(x, m):
    return ((x + m - 1) // m) * m


def _focal_elementwise(x, t, gamma, alpha):
    """Per-element sigmoid focal loss in f32.

    EUP budget: one exp, one log1p, one (exact) reciprocal per element.
    """
    x = x.astype(jnp.float32)
    t = t.astype(jnp.float32)

    e = jnp.exp(-jnp.abs(x))                 # shared by sigmoid and the BCE log term
    inv = 1.0 / (1.0 + e)
    p = jnp.where(x >= 0.0, inv, e * inv)    # == sigmoid(x)

    # numerically stable BCE-with-logits: max(x,0) - x*t + log(1 + exp(-|x|))
    ce = jnp.maximum(x, 0.0) - x * t + jnp.log1p(e)

    p_t = p * t + (1.0 - p) * (1.0 - t)
    one_minus_pt = 1.0 - p_t

    g = float(gamma)
    if g == int(g) and 0 <= int(g) <= 8:
        # integer-gamma fast path: multiplies only (no pow -> log+exp)
        factor = jnp.ones_like(one_minus_pt)
        for _ in range(int(g)):
            factor = factor * one_minus_pt
    else:
        factor = jnp.power(one_minus_pt, jnp.float32(g))

    alpha_t = alpha * t + (1.0 - alpha) * (1.0 - t)
    return alpha_t * ce * factor


def _focal_none_kernel(x_ref, t_ref, o_ref, *, gamma, alpha):
    o_ref[...] = _focal_elementwise(x_ref[...], t_ref[...], gamma, alpha).astype(o_ref.dtype)


def _focal_psum_kernel(x_ref, t_ref, psum_ref, *, gamma, alpha):
    loss = _focal_elementwise(x_ref[...], t_ref[...], gamma, alpha)
    rows, lanes = loss.shape
    # VPU-only partial reduction: fold groups of 8 sublanes with elementwise
    # adds; the remaining (8, lanes) -> scalar reduce happens outside the kernel.
    psum_ref[...] = jnp.sum(loss.reshape(rows // 8, 8, lanes), axis=0)


def _flatten_and_pad(logits, targets):
    orig_shape = logits.shape
    total = int(math.prod(orig_shape))
    rows_needed = max(1, pl.cdiv(total, _LANE_W))
    block_rows = min(_MAX_BLOCK_ROWS, _round_up(rows_needed, _SUBLANE_QUANT))
    rows_padded = _round_up(rows_needed, block_rows)
    padded_total = rows_padded * _LANE_W
    pad = padded_total - total

    def prep(a, pad_value):
        if a.dtype not in (jnp.float32, jnp.bfloat16):
            a = a.astype(jnp.float32)
        flat = jnp.ravel(a)
        if pad:
            flat = jnp.pad(flat, (0, pad), constant_values=pad_value)
        return flat.reshape(rows_padded, _LANE_W)

    x2 = prep(logits, _PAD_LOGIT)   # padded logits -> loss contribution exactly 0
    t2 = prep(targets, 0.0)
    return x2, t2, total, block_rows, rows_padded


def sigmoid_focal_loss(logits, targets, *, gamma, alpha, reduction="mean"):
    """Pallas TPU sigmoid focal loss. logits/targets: any (matching) shape."""
    assert logits.shape == targets.shape, "logits/targets shape mismatch"
    orig_shape = logits.shape
    x2, t2, total, block_rows, rows_padded = _flatten_and_pad(logits, targets)
    grid = rows_padded // block_rows

    compiler_params = pltpu.CompilerParams(
        dimension_semantics=("parallel",),
        vmem_limit_bytes=_VMEM_LIMIT_BYTES,
    )
    in_specs = [
        pl.BlockSpec((block_rows, _LANE_W), lambda i: (i, 0)),
        pl.BlockSpec((block_rows, _LANE_W), lambda i: (i, 0)),
    ]

    if reduction == "none":
        kernel = functools.partial(_focal_none_kernel, gamma=gamma, alpha=alpha)
        out = pl.pallas_call(
            kernel,
            out_shape=jax.ShapeDtypeStruct((rows_padded, _LANE_W), jnp.float32),
            grid_spec=pltpu.PrefetchScalarGridSpec(
                num_scalar_prefetch=0,
                grid=(grid,),
                in_specs=in_specs,
                out_specs=pl.BlockSpec((block_rows, _LANE_W), lambda i: (i, 0)),
            ),
            compiler_params=compiler_params,
        )(x2, t2)
        return out.ravel()[:total].reshape(orig_shape)

    if reduction not in ("sum", "mean"):
        raise ValueError(f"unknown reduction: {reduction}")

    kernel = functools.partial(_focal_psum_kernel, gamma=gamma, alpha=alpha)
    partials = pl.pallas_call(
        kernel,
        out_shape=jax.ShapeDtypeStruct((grid * 8, _LANE_W), jnp.float32),
        grid_spec=pltpu.PrefetchScalarGridSpec(
            num_scalar_prefetch=0,
            grid=(grid,),
            in_specs=in_specs,
            out_specs=pl.BlockSpec((8, _LANE_W), lambda i: (i, 0)),
        ),
        compiler_params=compiler_params,
    )(x2, t2)

    total_sum = jnp.sum(partials, dtype=jnp.float32)
    if reduction == "sum":
        return total_sum
    return total_sum / jnp.float32(total)   # divide by original numel (padding excluded)


class SigmoidFocalLoss:
    """JAX/Pallas analogue of maskrcnn_benchmark SigmoidFocalLoss module (forward only)."""

    def __init__(self, gamma, alpha):
        self.gamma = float(gamma)
        self.alpha = float(alpha)

    def __call__(self, logits, targets, reduction="mean"):
        return sigmoid_focal_loss(
            logits, targets, gamma=self.gamma, alpha=self.alpha, reduction=reduction
        )

    def __repr__(self):
        return f"SigmoidFocalLoss(gamma={self.gamma}, alpha={self.alpha})"


def _reference(logits, targets, gamma, alpha, reduction):
    p = jax.nn.sigmoid(logits)
    ce = jnp.maximum(logits, 0.0) - logits * targets + jnp.log1p(jnp.exp(-jnp.abs(logits)))
    p_t = p * targets + (1 - p) * (1 - targets)
    loss = ce * (1 - p_t) ** gamma
    alpha_t = alpha * targets + (1 - alpha) * (1 - targets)
    loss = alpha_t * loss
    if reduction == "mean":
        return loss.mean()
    if reduction == "sum":
        return loss.sum()
    return loss


if __name__ == "__main__":
    key = jax.random.PRNGKey(0)
    k1, k2, k3, k4 = jax.random.split(key, 4)

    loss_fn = SigmoidFocalLoss(gamma=2.0, alpha=0.25)

    ok = True
    # Tile-aligned case and a ragged case (exercises the padding/masking path).
    cases = (((64, 128), k1, k2), ((37, 80), k3, k4))
    for (N, C), ka, kb in cases:
        logits = jax.random.normal(ka, (N, C), dtype=jnp.float32) * 3.0
        targets = (jax.random.uniform(kb, (N, C)) < 0.1).astype(jnp.float32)
        for reduction in ("mean", "sum", "none"):
            out = jax.block_until_ready(loss_fn(logits, targets, reduction=reduction))
            ref = _reference(logits, targets, 2.0, 0.25, reduction)
            if not jnp.allclose(out, ref, rtol=1e-5, atol=1e-5):
                ok = False

    # Non-integer gamma exercises the general pow path.
    logits = jax.random.normal(k1, (37, 80), dtype=jnp.float32) * 3.0
    targets = (jax.random.uniform(k2, (37, 80)) < 0.1).astype(jnp.float32)
    out = jax.block_until_ready(
        sigmoid_focal_loss(logits, targets, gamma=1.5, alpha=0.25, reduction="sum")
    )
    ref = _reference(logits, targets, 1.5, 0.25, "sum")
    if not jnp.allclose(out, ref, rtol=1e-5, atol=1e-5):
        ok = False

    if ok:
        print("KERNEL_OK")
</pallas_src>

<mosaic_0001>
module attributes {stable_mosaic.version = 11 : i64} {
  func.func @_focal_psum_kernel(%arg0: i32, %arg1: memref<16x512xf32, #tpu.memory_space<vmem>>, %arg2: memref<16x512xf32, #tpu.memory_space<vmem>>, %arg3: memref<8x512xf32, #tpu.memory_space<vmem>>) attributes {dimension_semantics = [#tpu.dimension_semantics<parallel>], iteration_bounds = array<i64: 1>, scalar_prefetch = 0 : i64, scratch_operands = 0 : i64, tpu.core_type = #tpu.core_type<tc>, window_params = [{transform_indices = @transform_0, window_bounds = array<i64: 16, 512>}, {transform_indices = @transform_1, window_bounds = array<i64: 16, 512>}, {transform_indices = @transform_2, window_bounds = array<i64: 8, 512>}]} {
    %c0 = arith.constant 0 : index
    %c0_0 = arith.constant 0 : index
    %0 = vector.load %arg1[%c0, %c0_0] : memref<16x512xf32, #tpu.memory_space<vmem>>, vector<16x512xf32>
    %c0_1 = arith.constant 0 : index
    %c0_2 = arith.constant 0 : index
    %1 = vector.load %arg2[%c0_1, %c0_2] : memref<16x512xf32, #tpu.memory_space<vmem>>, vector<16x512xf32>
    %2 = math.absf %0 : vector<16x512xf32>
    %cst = arith.constant 0.000000e+00 : f32
    %3 = vector.broadcast %cst : f32 to vector<16x512xf32>
    %4 = arith.subf %3, %2 : vector<16x512xf32>
    %5 = math.exp %4 : vector<16x512xf32>
    %cst_3 = arith.constant 1.000000e+00 : f32
    %6 = vector.broadcast %cst_3 : f32 to vector<16x512xf32>
    %7 = arith.addf %6, %5 : vector<16x512xf32>
    %cst_4 = arith.constant 1.000000e+00 : f32
    %8 = vector.broadcast %cst_4 : f32 to vector<16x512xf32>
    %9 = arith.divf %8, %7 : vector<16x512xf32>
    %cst_5 = arith.constant 0.000000e+00 : f32
    %10 = vector.broadcast %cst_5 : f32 to vector<16x512xf32>
    %11 = arith.cmpf oge, %0, %10 : vector<16x512xf32>
    %12 = arith.mulf %5, %9 : vector<16x512xf32>
    %13 = arith.select %11, %9, %12 : vector<16x512xi1>, vector<16x512xf32>
    %cst_6 = arith.constant 0.000000e+00 : f32
    %14 = vector.broadcast %cst_6 : f32 to vector<16x512xf32>
    %15 = arith.maximumf %0, %14 : vector<16x512xf32>
    %16 = arith.mulf %0, %1 : vector<16x512xf32>
    %17 = arith.subf %15, %16 : vector<16x512xf32>
    %18 = math.log1p %5 : vector<16x512xf32>
    %19 = arith.addf %17, %18 : vector<16x512xf32>
    %20 = arith.mulf %13, %1 : vector<16x512xf32>
    %cst_7 = arith.constant 1.000000e+00 : f32
    %21 = vector.broadcast %cst_7 : f32 to vector<16x512xf32>
    %22 = arith.subf %21, %13 : vector<16x512xf32>
    %cst_8 = arith.constant 1.000000e+00 : f32
    %23 = vector.broadcast %cst_8 : f32 to vector<16x512xf32>
    %24 = arith.subf %23, %1 : vector<16x512xf32>
    %25 = arith.mulf %22, %24 : vector<16x512xf32>
    %26 = arith.addf %20, %25 : vector<16x512xf32>
    %cst_9 = arith.constant 1.000000e+00 : f32
    %27 = vector.broadcast %cst_9 : f32 to vector<16x512xf32>
    %28 = arith.subf %27, %26 : vector<16x512xf32>
    %cst_10 = arith.constant 1.000000e+00 : f32
    %29 = vector.broadcast %cst_10 : f32 to vector<16x512xf32>
    %30 = arith.mulf %29, %28 : vector<16x512xf32>
    %31 = arith.mulf %30, %28 : vector<16x512xf32>
    %cst_11 = arith.constant 2.500000e-01 : f32
    %32 = vector.broadcast %cst_11 : f32 to vector<16x512xf32>
    %33 = arith.mulf %32, %1 : vector<16x512xf32>
    %cst_12 = arith.constant 1.000000e+00 : f32
    %34 = vector.broadcast %cst_12 : f32 to vector<16x512xf32>
    %35 = arith.subf %34, %1 : vector<16x512xf32>
    %cst_13 = arith.constant 7.500000e-01 : f32
    %36 = vector.broadcast %cst_13 : f32 to vector<16x512xf32>
    %37 = arith.mulf %36, %35 : vector<16x512xf32>
    %38 = arith.addf %33, %37 : vector<16x512xf32>
    %39 = arith.mulf %38, %19 : vector<16x512xf32>
    %40 = arith.mulf %39, %31 : vector<16x512xf32>
    %41 = vector.shape_cast %40 : vector<16x512xf32> to vector<2x8x512xf32>
    %cst_14 = arith.constant dense<0.000000e+00> : vector<8x512xf32>
    %42 = vector.multi_reduction <add>, %41, %cst_14 [0] : vector<2x8x512xf32> to vector<8x512xf32>
    %c0_15 = arith.constant 0 : index
    %c0_16 = arith.constant 0 : index
    %43 = vector.load %arg3[%c0_15, %c0_16] : memref<8x512xf32, #tpu.memory_space<vmem>>, vector<8x512xf32>
    tpu.vector_store %arg3[%c0_15, %c0_16], %42 {strides = array<i32>} : memref<8x512xf32, #tpu.memory_space<vmem>>, vector<8x512xf32>,
    return
  }
  func.func @transform_0(%arg0: i32) -> (i32, i32) {
    %c0_i32 = arith.constant 0 : i32
    %c0_i32_0 = arith.constant 0 : i32
    return %arg0, %c0_i32 : i32, i32
  }
  func.func @transform_1(%arg0: i32) -> (i32, i32) {
    %c0_i32 = arith.constant 0 : i32
    %c0_i32_0 = arith.constant 0 : i32
    return %arg0, %c0_i32 : i32, i32
  }
  func.func @transform_2(%arg0: i32) -> (i32, i32) {
    %c0_i32 = arith.constant 0 : i32
    %c0_i32_0 = arith.constant 0 : i32
    return %arg0, %c0_i32 : i32, i32
  }
}

</mosaic_0001>

<bundles_post_ra>
// kernel: tpu_custom_call.1
= control target key start
LH: loop header
LB: loop body
LE: loop exit
PB: predicated region body
PF: predicated region fallthrough
CT: control target
= control target key end

     0   :  { %7 = vsyncpa [#allocation3], 0  ;;  %s766_s0 = inlined_call_operand.hbm [shape: f32[16,512], index: 0, kind: input, shape index: {}]   ;;  %s767_s1 = inlined_call_operand.hbm [shape: f32[16,512], index: 1, kind: input, shape index: {}]   ;;  %s768_s2 = inlined_call_operand.hbm [shape: f32[8,512], index: 2, kind: output, shape index: {}]  }
   0x1   :  { %8 = vsyncpa [#allocation6], 0 }
   0x2   :  { %9 = vsyncpa [#allocation4], 0  ;;  %s479_s9 = smov [#allocation2]  }
   0x3   :  { %s15_s10 = sshll.u32 %s479_s9, 4  ;;  %s16_s10 = int_to_ptr.vmem [resolvable:$true] %s15_s10 }
   0x4   :  { %s421_s11 = scalar_lea.vmem %s16_s10, 1024  ;;  %p426_p1 = scmp.lt.s32.totalorder %s16_s10, %s16_s10 }
   0x5   :  { %p422_p0 = scmp.ne.s32.totalorder %s16_s10, %s421_s11  ;;  %p427_p2 = scmp.lt.s32.totalorder %s421_s11, %s421_s11 }
   0x7   :  { %p428_p3 = por %p427_p2, %p426_p1 }
   0x9   :  { %p429_p4 = pnand %p428_p3, %p422_p0 }
   0xb   :  { %432 = shalt.err (!%p429_p4)
}
   0xc   :  { %s480_s12 = smov 512   ;;  %s481_s13 = smov 32  }
   0xd   :  { %21 = dma.hbm_to_vmem [thread:$0]  %s766_s0, 1024, %s16_s10, [#allocation3], %s480_s12, %s480_s12, %s481_s13  }
   0xe   :  { %s482_s16 = smov [#allocation5]  }
   0xf   :  { %s27_s17 = sshll.u32 %s482_s16, 4  ;;  %s28_s17 = int_to_ptr.vmem [resolvable:$true] %s27_s17 }
  0x10   :  { %s441_s18 = scalar_lea.vmem %s28_s17, 1024  ;;  %p446_p6 = scmp.lt.s32.totalorder %s28_s17, %s28_s17 }
  0x11   :  { %p442_p5 = scmp.ne.s32.totalorder %s28_s17, %s441_s18  ;;  %p447_p7 = scmp.lt.s32.totalorder %s441_s18, %s441_s18 }
  0x13   :  { %p448_p8 = por %p447_p7, %p446_p6 }
  0x15   :  { %p449_p9 = pnand %p448_p8, %p442_p5 }
  0x17   :  { %452 = shalt.err (!%p449_p9)
}
  0x18   :  { %33 = dma.hbm_to_vmem [thread:$0]  %s767_s1, 1024, %s28_s17, [#allocation6], %s480_s12, %s480_s12, %s481_s13  }
  0x19   :  { %473 = dma.done.wait [#allocation3], 1024  }
  0x1a   :  { %474 = vsyncadd [#allocation3], 4294966272 }
  0x1b   :  { %475 = dma.done.wait [#allocation6], 1024  }
  0x1c   :  { %476 = vsyncadd [#allocation6], 4294966272  ;;  %v505_v0 = vld [vmem:[#allocation2] sm:$0xff]  ;;  %v511_v6 = vld [vmem:[#allocation2 + $0x8] sm:$0xff]  ;;  %s483_s0 = smov [#allocation7]  }
  0x1d   :  { %v507_v1 = vld [vmem:[#allocation2 + $0x20] sm:$0xff]  ;;  %v56_v2 = vand.u32 2147483647, %v505_v0  ;;  %v513_v7 = vld [vmem:[#allocation2 + $0x28] sm:$0xff]  ;;  %v57_v10 = vand.u32 2147483647, %v511_v6 }
  0x1e   :  { %v60_v3 = vand.u32 2147483647, %v507_v1  ;;  %v61_v11 = vand.u32 2147483647, %v513_v7  ;;  %v517_v14 = vld [vmem:[#allocation2 + $0x10] sm:$0xff]  ;;  %v521_v16 = vld [vmem:[#allocation5] sm:$0xff] }
  0x1f   :  { %v64_v4 = vsub.f32 0.0, %v56_v2  ;;  %v65_v12 = vsub.f32 0.0, %v57_v10  ;;  %v519_v15 = vld [vmem:[#allocation2 + $0x30] sm:$0xff]  ;;  %v523_v19 = vld [vmem:[#allocation5 + $0x20] sm:$0xff]  ;;  %v58_v20 = vand.u32 2147483647, %v517_v14  ;;  %v144_v23 = vmul.f32 %v521_v16, %v505_v0 }
  0x20   :  { %v68_v5 = vsub.f32 0.0, %v60_v3  ;;  %v69_v13 = vsub.f32 0.0, %v61_v11  ;;  %v62_v21 = vand.u32 2147483647, %v519_v15  ;;  %v136_v22 = vmax.f32 %v505_v0, 0.0  ;;  %v531_v25 = vld [vmem:[#allocation5 + $0x8] sm:$0xff] }
  0x21   :  { %v72_v8 = vmul.f32 1.442695, %v64_v4  ;;  %v74_v17 = vmul.f32 1.442695, %v65_v12  ;;  %v256_v24 = vsub.f32 1.0, %v521_v16  ;;  %v140_v26 = vmax.f32 %v507_v1, 0.0 }
  0x22   :  { %v80_v9 = vmul.f32 1.442695, %v68_v5  ;;  %v82_v18 = vmul.f32 1.442695, %v69_v13  ;;  %v260_v27 = vsub.f32 1.0, %v523_v19  ;;  %v535_v28 = vld [vmem:[#allocation5 + $0x28] sm:$0xff]  ;;  %v148_v31 = vmul.f32 %v523_v19, %v507_v1 }
  0x23   :  { %365 = vpow2.f32 %v72_v8  ;;  %v66_v29 = vsub.f32 0.0, %v58_v20  ;;  %v70_v30 = vsub.f32 0.0, %v62_v21  ;;  %v296_v32 = vmul.f32 0.25, %v521_v16  ;;  %v572_v55 = vld [vmem:[#allocation5 + $0x10] sm:$0xff]  ;;  %v583_v61 = vld [vmem:[#allocation2 + $0x18] sm:$0xff]  ;;  %s350_s1 = sshll.u32 %s483_s0, 4  ;;  %s351_s1 = int_to_ptr.vmem [resolvable:$true] %s350_s1 }
  0x24   :  { %367 = vpow2.f32 %v80_v9  ;;  %v300_v33 = vmul.f32 0.25, %v523_v19  ;;  %v304_v34 = vmul.f32 0.75, %v256_v24  ;;  %v308_v35 = vmul.f32 0.75, %v260_v27  ;;  %v581_v60 = vld [vmem:[#allocation5 + $0x30] sm:$0xff]  ;;  %v589_v3 = vld [vmem:[#allocation2 + $0x38] sm:$0xff]  ;;  %s453_s21 = scalar_lea.vmem %s351_s1, 512  ;;  %p458_p11 = scmp.lt.s32.totalorder %s351_s1, %s351_s1 }
  0x25   :  { %369 = vpow2.f32 %v74_v17  ;;  %v257_v36 = vsub.f32 1.0, %v531_v25  ;;  %v76_v37 = vmul.f32 1.442695, %v66_v29  ;;  %v84_v38 = vmul.f32 1.442695, %v70_v30  ;;  %p454_p10 = scmp.ne.s32.totalorder %s351_s1, %s453_s21  ;;  %p459_p12 = scmp.lt.s32.totalorder %s453_s21, %s453_s21 }
  0x26   :  { %371 = vpow2.f32 %v82_v18  ;;  %v137_v39 = vmax.f32 %v511_v6, 0.0  ;;  %v141_v40 = vmax.f32 %v513_v7, 0.0  ;;  %v145_v41 = vmul.f32 %v531_v25, %v511_v6 }
  0x27   :  { %v261_v42 = vsub.f32 1.0, %v535_v28  ;;  %v149_v43 = vmul.f32 %v535_v28, %v513_v7  ;;  %v297_v44 = vmul.f32 0.25, %v531_v25  ;;  %v305_v45 = vmul.f32 0.75, %v257_v36  ;;  %p460_p13 = por %p459_p12, %p458_p11 }
  0x28   :  { %373 = vpow2.f32 %v76_v37  ;;  %v301_v46 = vmul.f32 0.25, %v535_v28  ;;  %v561_v49 = vsub.f32 %v136_v22, %v144_v23  ;;  %v566_v52 = vsub.f32 %v140_v26, %v148_v31 }
  0x29   :  { %v309_v47 = vmul.f32 0.75, %v261_v42  ;;  %375 = vpow2.f32 %v84_v38  ;;  %v568_v53 = vadd.f32 %v304_v34, %v296_v32  ;;  %v570_v54 = vadd.f32 %v308_v35, %v300_v33  ;;  %p461_p0 = pnand %p460_p13, %p454_p10 }
  0x2a   :  { %v575_v57 = vsub.f32 %v137_v39, %v145_v41  ;;  %v577_v58 = vsub.f32 %v141_v40, %v149_v43  ;;  %v579_v59 = vadd.f32 %v305_v45, %v297_v44  ;;  %v138_v63 = vmax.f32 %v517_v14, 0.0 }
  0x2b   :  { %v585_v62 = vadd.f32 %v309_v47, %v301_v46  ;;  %v142_v2 = vmax.f32 %v519_v15, 0.0  ;;  %v146_v4 = vmul.f32 %v572_v55, %v517_v14  ;;  %v150_v5 = vmul.f32 %v581_v60, %v519_v15 }
  0x2c   :  { %v258_v8 = vsub.f32 1.0, %v572_v55  ;;  %v262_v10 = vsub.f32 1.0, %v581_v60  ;;  %v298_v11 = vmul.f32 0.25, %v572_v55  ;;  %v59_v12 = vand.u32 2147483647, %v583_v61 }
  0x2d   :  { %v302_v18 = vmul.f32 0.25, %v581_v60  ;;  %v63_v20 = vand.u32 2147483647, %v589_v3  ;;  %vm112_vm0 = vcmp.ge.f32.partialorder %v505_v0, 0.0  ;;  %v613_v30 = vsub.f32 %v138_v63, %v146_v4 }
  0x2e   :  { %v306_v26 = vmul.f32 0.75, %v258_v8  ;;  %v615_v31 = vsub.f32 %v142_v2, %v150_v5  ;;  %vm116_vm1 = vcmp.ge.f32.partialorder %v507_v1, 0.0  ;;  %v310_v33 = vmul.f32 0.75, %v262_v10 }
  0x2f   :  { %v67_v34 = vsub.f32 0.0, %v59_v12  ;;  %v71_v38 = vsub.f32 0.0, %v63_v20  ;;  %vm113_vm2 = vcmp.ge.f32.partialorder %v511_v6, 0.0  ;;  %vm117_vm5 = vcmp.ge.f32.partialorder %v513_v7, 0.0 }
  0x30   :  { %v559_v48 = vpop.eup %365  ;;  %v625_v43 = vadd.f32 %v306_v26, %v298_v11  ;;  %v634_v2 = vadd.f32 %v310_v33, %v302_v18  ;;  %vm114_vm8 = vcmp.ge.f32.partialorder %v517_v14, 0.0  ;;  %vm118_vm9 = vcmp.ge.f32.partialorder %v519_v15, 0.0 }
  0x31   :  { %v563_v50 = vpop.eup %367  ;;  %v88_v51 = vadd.f32 1.0, %v559_v48  ;;  %v163_v21 = vmul.f32 -0.5, %v559_v48  ;;  %v166_v35 = vand.u32 2147483647, %v559_v48  ;;  %v78_v4 = vmul.f32 1.442695, %v67_v34 }
  0x32   :  { %v92_v56 = vadd.f32 1.0, %v563_v50  ;;  %v596_v9 = vpop.eup %369  ;;  %v199_v22 = vmul.f32 -0.5, %v563_v50  ;;  %v202_v37 = vand.u32 2147483647, %v563_v50  ;;  %v86_v12 = vmul.f32 1.442695, %v71_v38 }
  0x33   :  { %377 = vrcp.f32 %v88_v51  ;;  %v601_v13 = vpop.eup %371  ;;  %v89_v17 = vadd.f32 1.0, %v596_v9  ;;  %v172_v29 = vmul.f32 -0.5, %v596_v9  ;;  %v164_v40 = vadd.f32 1.0, %v163_v21 }
  0x34   :  { %379 = vrcp.f32 %v92_v56  ;;  %v93_v23 = vadd.f32 1.0, %v601_v13  ;;  %v208_v32 = vmul.f32 -0.5, %v601_v13  ;;  %v200_v41 = vadd.f32 1.0, %v199_v22 }
  0x35   :  { %381 = vlog2.f32 %v88_v51  ;;  %v623_v39 = vpop.eup %373  ;;  %v173_v45 = vadd.f32 1.0, %v172_v29  ;;  %v175_v46 = vand.u32 2147483647, %v596_v9  ;;  %v211_v47 = vand.u32 2147483647, %v601_v13 }
  0x36   :  { %383 = vlog2.f32 %v92_v56  ;;  %v627_v44 = vpop.eup %375  ;;  %v90_v51 = vadd.f32 1.0, %v623_v39  ;;  %v209_v56 = vadd.f32 1.0, %v208_v32  ;;  %vm636_vm3 = vcmp.lt.f32.partialorder %v166_v35, 0.0004427343 }
  0x37   :  { %385 = vrcp.f32 %v89_v17  ;;  %v94_v63 = vadd.f32 1.0, %v627_v44  ;;  %vm640_vm4 = vcmp.lt.f32.partialorder %v202_v37, 0.0004427343  ;;  %v201_v20 = vmul.f32 %v563_v50, %v200_v41 }
  0x38   :  { %387 = vrcp.f32 %v93_v23  ;;  %v181_v18 = vmul.f32 -0.5, %v623_v39  ;;  %v174_v22 = vmul.f32 %v596_v9, %v173_v45  ;;  %vm649_vm6 = vcmp.lt.f32.partialorder %v175_v46, 0.0004427343 }
  0x39   :  { %389 = vlog2.f32 %v89_v17  ;;  %v165_v17 = vmul.f32 %v559_v48, %v164_v40  ;;  %vm653_vm7 = vcmp.lt.f32.partialorder %v211_v47, 0.0004427343  ;;  %v210_v33 = vmul.f32 %v601_v13, %v209_v56 }
  0x3a   :  { %391 = vlog2.f32 %v93_v23  ;;  %v217_v34 = vmul.f32 -0.5, %v627_v44  ;;  %v184_v38 = vand.u32 2147483647, %v623_v39  ;;  %v220_v40 = vand.u32 2147483647, %v627_v44 }
  0x3b   :  { %393 = vrcp.f32 %v90_v51  ;;  %vm115_vm12 = vcmp.ge.f32.partialorder %v583_v61, 0.0  ;;  %vm119_vm13 = vcmp.ge.f32.partialorder %v589_v3, 0.0 }
  0x3c   :  { %395 = vrcp.f32 %v94_v63  ;;  %vm679_vm10 = vcmp.lt.f32.partialorder %v184_v38, 0.0004427343  ;;  %vm688_vm11 = vcmp.lt.f32.partialorder %v220_v40, 0.0004427343 }
  0x3d   :  { %397 = vlog2.f32 %v90_v51 }
  0x3e   :  { %399 = vlog2.f32 %v94_v63 }
  0x3f   :  { %401 = vpow2.f32 %v78_v4 }
  0x40   :  { %v378_v21 = vpop.eup %377  ;;  %403 = vpow2.f32 %v86_v12 }
  0x41   :  { %v380_v29 = vpop.eup %379  ;;  %v120_v32 = vmul.f32 %v378_v21, %v559_v48  ;;  %v182_v48 = vadd.f32 1.0, %v181_v18 }
  0x42   :  { %v382_v35 = vpop.eup %381  ;;  %v124_v37 = vmul.f32 %v380_v29, %v563_v50 }
  0x43   :  { %v384_v41 = vpop.eup %383  ;;  %v128_v45 = vsel %vm112_vm0, %v378_v21, %v120_v32  ;;  %v162_v46 = vmul.f32 0.6931472, %v382_v35  ;;  %v218_v32 = vadd.f32 1.0, %v217_v34 }
  0x44   :  { %v132_v47 = vsel %vm116_vm1, %v380_v29, %v124_v37  ;;  %v198_v51 = vmul.f32 0.6931472, %v384_v41  ;;  %v240_v50 = vmul.f32 %v128_v45, %v521_v16  ;;  %v248_v56 = vsub.f32 1.0, %v128_v45  ;;  %v386_v63 = vpop.eup %385 }
  0x45   :  { %v168_v4 = vsel %vm636_vm3, %v165_v17, %v162_v46  ;;  %v244_v0 = vmul.f32 %v132_v47, %v523_v19  ;;  %v252_v21 = vsub.f32 1.0, %v132_v47  ;;  %v388_v35 = vpop.eup %387  ;;  %v121_v29 = vmul.f32 %v386_v63, %v596_v9 }
  0x46   :  { %v204_v12 = vsel %vm640_vm4, %v201_v20, %v198_v51  ;;  %v232_v1 = vadd.f32 %v168_v4, %v561_v49  ;;  %v264_v18 = vmul.f32 %v256_v24, %v248_v56  ;;  %v390_v5 = vpop.eup %389  ;;  %v125_v11 = vmul.f32 %v388_v35, %v601_v13 }
  0x47   :  { %v236_v17 = vadd.f32 %v204_v12, %v566_v52  ;;  %v268_v34 = vmul.f32 %v260_v27, %v252_v21  ;;  %v183_v20 = vmul.f32 %v623_v39, %v182_v48  ;;  %v392_v16 = vpop.eup %391  ;;  %v129_v38 = vsel %vm113_vm2, %v386_v63, %v121_v29 }
  0x48   :  { %v272_v24 = vadd.f32 %v264_v18, %v240_v50  ;;  %v320_v9 = vmul.f32 %v568_v53, %v232_v1  ;;  %v171_v41 = vmul.f32 0.6931472, %v390_v5  ;;  %v133_v27 = vsel %vm117_vm5, %v388_v35, %v125_v11  ;;  %v394_v53 = vpop.eup %393 }
  0x49   :  { %v276_v52 = vadd.f32 %v268_v34, %v244_v0  ;;  %v324_v19 = vmul.f32 %v570_v54, %v236_v17  ;;  %v207_v13 = vmul.f32 0.6931472, %v392_v16  ;;  %v241_v46 = vmul.f32 %v129_v38, %v531_v25  ;;  %v396_v50 = vpop.eup %395 }
  0x4a   :  { %v280_v45 = vsub.f32 1.0, %v272_v24  ;;  %v177_v40 = vsel %vm649_vm6, %v174_v22, %v171_v41  ;;  %v245_v48 = vmul.f32 %v133_v27, %v535_v28  ;;  %v249_v54 = vsub.f32 1.0, %v129_v38  ;;  %v398_v22 = vpop.eup %397 }
  0x4b   :  { %v284_v47 = vsub.f32 1.0, %v276_v52  ;;  %v213_v6 = vsel %vm653_vm7, %v210_v33, %v207_v13  ;;  %v233_v51 = vadd.f32 %v177_v40, %v575_v57  ;;  %v253_v63 = vsub.f32 1.0, %v133_v27  ;;  %v400_v33 = vpop.eup %399 }
  0x4c   :  { %v288_v7 = vmul.f32 %v280_v45, %v280_v45  ;;  %v237_v56 = vadd.f32 %v213_v6, %v577_v58  ;;  %v122_v23 = vmul.f32 %v394_v53, %v623_v39  ;;  %v265_v0 = vmul.f32 %v257_v36, %v249_v54  ;;  %v716_v39 = vpop.eup %401  ;;  %v55_v6 = vld [vmem:[#allocation5 + $0x38] sm:$0xff] }
  0x4d   :  { %v292_v4 = vmul.f32 %v284_v47, %v284_v47  ;;  %v126_v21 = vmul.f32 %v396_v50, %v627_v44  ;;  %v219_v26 = vmul.f32 %v627_v44, %v218_v32  ;;  %v269_v57 = vmul.f32 %v261_v42, %v253_v63  ;;  %v720_v29 = vpop.eup %403  ;;  %v51_v47 = vld [vmem:[#allocation5 + $0x18] sm:$0xff] }
  0x4e   :  { %v328_v35 = vmul.f32 %v320_v9, %v288_v7  ;;  %v321_v12 = vmul.f32 %v579_v59, %v233_v51  ;;  %v130_v58 = vsel %vm114_vm8, %v394_v53, %v122_v23  ;;  %v273_v18 = vadd.f32 %v265_v0, %v241_v46 }
  0x4f   :  { %v332_v1 = vmul.f32 %v324_v19, %v292_v4  ;;  %v134_v25 = vsel %vm118_vm9, %v396_v50, %v126_v21  ;;  %v180_v36 = vmul.f32 0.6931472, %v398_v22  ;;  %v277_v44 = vadd.f32 %v269_v57, %v245_v48 }
  0x50   :  { %v325_v32 = vmul.f32 %v585_v62, %v237_v56  ;;  %v216_v28 = vmul.f32 0.6931472, %v400_v33  ;;  %v242_v42 = vmul.f32 %v130_v58, %v572_v55  ;;  %v281_v5 = vsub.f32 1.0, %v273_v18 }
  0x51   :  { %v336_v59 = vadd.f32 %v332_v1, %v328_v35  ;;  %v186_v14 = vsel %vm679_vm10, %v183_v20, %v180_v36  ;;  %v250_v17 = vsub.f32 1.0, %v130_v58  ;;  %v285_v34 = vsub.f32 1.0, %v277_v44 }
  0x52   :  { %v222_v15 = vsel %vm688_vm11, %v219_v26, %v216_v28  ;;  %v246_v11 = vmul.f32 %v134_v25, %v581_v60  ;;  %v254_v16 = vsub.f32 1.0, %v134_v25  ;;  %v289_v24 = vmul.f32 %v281_v5, %v281_v5 }
  0x53   :  { %340 = vst [vmem:[#allocation7] sm:$0xff] %v336_v59  ;;  %v234_v62 = vadd.f32 %v186_v14, %v613_v30  ;;  %v266_v9 = vmul.f32 %v258_v8, %v250_v17  ;;  %v91_v38 = vadd.f32 1.0, %v716_v39  ;;  %v293_v41 = vmul.f32 %v285_v34, %v285_v34 }
  0x54   :  { %v238_v37 = vadd.f32 %v222_v15, %v615_v31  ;;  %v270_v20 = vmul.f32 %v262_v10, %v254_v16  ;;  %v95_v49 = vadd.f32 1.0, %v720_v29  ;;  %v329_v52 = vmul.f32 %v321_v12, %v289_v24 }
  0x55   :  { %v274_v19 = vadd.f32 %v266_v9, %v242_v42  ;;  %405 = vrcp.f32 %v91_v38  ;;  %v333_v27 = vmul.f32 %v325_v32, %v293_v41  ;;  %v322_v55 = vmul.f32 %v625_v43, %v234_v62 }
  0x56   :  { %v278_v13 = vadd.f32 %v270_v20, %v246_v11  ;;  %407 = vrcp.f32 %v95_v49  ;;  %v326_v40 = vmul.f32 %v634_v2, %v238_v37  ;;  %v190_v46 = vmul.f32 -0.5, %v716_v39 }
  0x57   :  { %v282_v30 = vsub.f32 1.0, %v274_v19  ;;  %409 = vlog2.f32 %v91_v38  ;;  %v337_v8 = vadd.f32 %v333_v27, %v329_v52  ;;  %v226_v53 = vmul.f32 -0.5, %v720_v29 }
  0x58   :  { %v286_v45 = vsub.f32 1.0, %v278_v13  ;;  %411 = vlog2.f32 %v95_v49  ;;  %v139_v51 = vmax.f32 %v583_v61, 0.0  ;;  %v143_v54 = vmax.f32 %v589_v3, 0.0 }
  0x59   :  { %v290_v31 = vmul.f32 %v282_v30, %v282_v30  ;;  %341 = vst [vmem:[#allocation7 + $0x8] sm:$0xff] %v337_v8  ;;  %v147_v50 = vmul.f32 %v51_v47, %v583_v61  ;;  %v151_v2 = vmul.f32 %v55_v6, %v589_v3  ;;  %v191_v7 = vadd.f32 1.0, %v190_v46 }
  0x5a   :  { %v294_v60 = vmul.f32 %v286_v45, %v286_v45  ;;  %v193_v56 = vand.u32 2147483647, %v716_v39  ;;  %v227_v63 = vadd.f32 1.0, %v226_v53  ;;  %v229_v23 = vand.u32 2147483647, %v720_v29 }
  0x5b   :  { %v330_v10 = vmul.f32 %v322_v55, %v290_v31  ;;  %v155_v4 = vsub.f32 %v139_v51, %v147_v50  ;;  %v159_v0 = vsub.f32 %v143_v54, %v151_v2  ;;  %v259_v21 = vsub.f32 1.0, %v51_v47 }
  0x5c   :  { %v334_v48 = vmul.f32 %v326_v40, %v294_v60  ;;  %v263_v26 = vsub.f32 1.0, %v55_v6  ;;  %v192_v57 = vmul.f32 %v716_v39, %v191_v7  ;;  %v299_v12 = vmul.f32 0.25, %v51_v47 }
  0x5d   :  { %v303_v58 = vmul.f32 0.25, %v55_v6  ;;  %vm752_vm14 = vcmp.lt.f32.partialorder %v193_v56, 0.0004427343  ;;  %v228_v36 = vmul.f32 %v720_v29, %v227_v63  ;;  %v307_v44 = vmul.f32 0.75, %v259_v21 }
  0x5e   :  { %v338_v43 = vadd.f32 %v334_v48, %v330_v10  ;;  %vm230_vm15 = vcmp.lt.f32.partialorder %v229_v23, 0.0004427343  ;;  %v311_v59 = vmul.f32 0.75, %v263_v26 }
  0x5f   :  { %v315_v62 = vadd.f32 %v307_v44, %v299_v12 }
  0x60   :  { %342 = vst [vmem:[#allocation7 + $0x10] sm:$0xff] %v338_v43  ;;  %v319_v38 = vadd.f32 %v311_v59, %v303_v58 }
  0x62   :  { %v406_v22 = vpop.eup %405 }
  0x63   :  { %v408_v33 = vpop.eup %407  ;;  %v123_v35 = vmul.f32 %v406_v22, %v716_v39 }
  0x64   :  { %v410_v1 = vpop.eup %409  ;;  %v127_v18 = vmul.f32 %v408_v33, %v720_v29 }
  0x65   :  { %v412_v32 = vpop.eup %411  ;;  %v131_v28 = vsel %vm115_vm12, %v406_v22, %v123_v35  ;;  %v189_v42 = vmul.f32 0.6931472, %v410_v1 }
  0x66   :  { %v135_v39 = vsel %vm119_vm13, %v408_v33, %v127_v18  ;;  %v225_v5 = vmul.f32 0.6931472, %v412_v32  ;;  %v243_v14 = vmul.f32 %v131_v28, %v51_v47  ;;  %v251_v17 = vsub.f32 1.0, %v131_v28 }
  0x67   :  { %v195_v34 = vsel %vm752_vm14, %v192_v57, %v189_v42  ;;  %v247_v15 = vmul.f32 %v135_v39, %v55_v6  ;;  %v255_v11 = vsub.f32 1.0, %v135_v39 }
  0x68   :  { %v231_v29 = vsel %vm230_vm15, %v228_v36, %v225_v5  ;;  %v235_v16 = vadd.f32 %v195_v34, %v155_v4  ;;  %v267_v24 = vmul.f32 %v259_v21, %v251_v17 }
  0x69   :  { %v239_v61 = vadd.f32 %v231_v29, %v159_v0  ;;  %v271_v9 = vmul.f32 %v263_v26, %v255_v11 }
  0x6a   :  { %v275_v41 = vadd.f32 %v267_v24, %v243_v14  ;;  %v323_v3 = vmul.f32 %v315_v62, %v235_v16 }
  0x6b   :  { %v279_v37 = vadd.f32 %v271_v9, %v247_v15  ;;  %v327_v52 = vmul.f32 %v319_v38, %v239_v61 }
  0x6c   :  { %v283_v20 = vsub.f32 1.0, %v275_v41 }
  0x6d   :  { %v287_v49 = vsub.f32 1.0, %v279_v37 }
  0x6e   :  { %v291_v19 = vmul.f32 %v283_v20, %v283_v20 }
  0x6f   :  { %v295_v27 = vmul.f32 %v287_v49, %v287_v49 }
  0x70   :  { %v331_v13 = vmul.f32 %v323_v3, %v291_v19 }
  0x71   :  { %v335_v30 = vmul.f32 %v327_v52, %v295_v27 }
  0x73   :  { %v339_v55 = vadd.f32 %v335_v30, %v331_v13 }
  0x75   :  { %343 = vst [vmem:[#allocation7 + $0x18] sm:$0xff] %v339_v55 }
  0x76   :  { %464 = shalt.err (!%p461_p0)
}
  0x77   :  { %353 = dma.vmem_to_hbm [thread:$0]  %s351_s1, 512, %s768_s2, [#allocation4]  }
  0x78   :  { %477 = dma.done.wait [#allocation4], 512  }
  0x79   :  { %478 = vsyncadd [#allocation4], 4294966784 }
  0x7a   :  { %357 = vsyncpa [#allocation3], 1 }
  0x7b   :  { %358 = vsyncpa [#allocation6], 1 }
  0x7c   :  { %359 = vsyncpa [#allocation4], 1 }

</bundles_post_ra>
